<compile_context>
chip_gen: v7x
topology: tpu7x:2x2x1
jax: 0.10.0
libtpu: 0.0.40
codegen_flags: <defaults>
</compile_context>

<pallas_src>
import functools

import jax
import jax.numpy as jnp
from jax.experimental import pallas as pl
from jax.experimental.pallas import tpu as pltpu


def _round_up(x, m):
    return ((x + m - 1) // m) * m


# ---------------------------------------------------------------------------
# Kernels
# ---------------------------------------------------------------------------

def _cosine_two_stream_kernel(xc_ref, xr_ref, wc_ref, wb_ref, bc_ref, bb_ref,
                              scores_ref, bbox_ref):
    # xc/xr tiles arrive in bf16; all non-MXU math stays in f32.
    xc = xc_ref[...]                                           # [tn, D] bf16
    xc_f32 = xc.astype(jnp.float32)
    sq = jnp.sum(xc_f32 * xc_f32, axis=1, keepdims=True)       # [tn, 1] f32
    inv = pl.reciprocal(jnp.sqrt(sq) + 1e-5, approx=True)      # EUP slot

    # Row norm folded onto the matmul output (per-row scalar commutes with
    # the matmul): tn*C_pad multiplies instead of tn*D, no [tn, D] temporary.
    s = jnp.dot(xc, wc_ref[...], preferred_element_type=jnp.float32)
    scores_ref[...] = s * inv + bc_ref[...]                    # bias pre-scaled x20

    b = jnp.dot(xr_ref[...], wb_ref[...], preferred_element_type=jnp.float32)
    bbox_ref[...] = b + bb_ref[...]


def _cosine_fused_kernel(x_ref, w_ref, bc_ref, bb_ref,
                         scores_ref, bbox_ref, *, c_pad):
    # Single input stream (xc is xr): one activation DMA per tile, one MXU op
    # against the concatenated [D, c_pad + 128] RHS.
    x = x_ref[...]                                             # [tn, D] bf16
    x_f32 = x.astype(jnp.float32)
    sq = jnp.sum(x_f32 * x_f32, axis=1, keepdims=True)
    inv = pl.reciprocal(jnp.sqrt(sq) + 1e-5, approx=True)

    s = jnp.dot(x, w_ref[...], preferred_element_type=jnp.float32)
    scores_ref[...] = s[:, :c_pad] * inv + bc_ref[...]         # cosine cols only
    bbox_ref[...] = s[:, c_pad:] + bb_ref[...]


# ---------------------------------------------------------------------------
# One-time parameter preprocessing (model-init time, not per forward call)
# ---------------------------------------------------------------------------

def preprocess_params(cls_w, cls_b, bbox_w, bbox_b, *, scale=20.0,
                      weight_dtype=jnp.bfloat16):
    C, D = cls_w.shape
    C_pad = _round_up(C, 128)          # lane-dense classifier output width
    B_pad = 128                        # lane-dense bbox slab (4 real cols)

    # L2-normalize classifier rows (matches the module's in-place
    # normalization; re-normalizing a normalized weight is idempotent),
    # fold the 20x cosine scale into weight + bias, transpose to [D, out].
    wc_n = cls_w / (jnp.linalg.norm(cls_w, axis=1, keepdims=True) + 1e-5)
    wc_t = jnp.pad((scale * wc_n).T, ((0, 0), (0, C_pad - C))).astype(weight_dtype)
    wb_t = jnp.pad(bbox_w.T, ((0, 0), (0, B_pad - bbox_w.shape[0]))).astype(weight_dtype)

    bc = jnp.pad(scale * cls_b, (0, C_pad - C)).reshape(1, C_pad).astype(jnp.float32)
    bb = jnp.pad(bbox_b, (0, B_pad - bbox_b.shape[0])).reshape(1, B_pad).astype(jnp.float32)

    return {
        "wc_t": wc_t, "wb_t": wb_t,
        "w_fused": jnp.concatenate([wc_t, wb_t], axis=1),      # [D, C_pad+128]
        "bc": bc, "bb": bb,
        "C": C, "C_pad": C_pad, "B_pad": B_pad, "D": D,
    }


# ---------------------------------------------------------------------------
# Forward
# ---------------------------------------------------------------------------

def fpn_cosine_predictor(xc, xr, params, *, num_bbox_reg_classes=2,
                         tile_n=512, input_dtype=jnp.bfloat16):
    N, D = xc.shape
    C, C_pad, B_pad = params["C"], params["C_pad"], params["B_pad"]
    fused = xc is xr

    # Row tile: big (mem-bound, ~0.35us/step overhead), but capped so the grid
    # has >= 2 steps when N is large (v7x: two TensorCores share the
    # "parallel" axis). Multiple of 16 for bf16 sublane packing. Ragged last
    # tile -- no jnp.pad copy of the activations.
    tn = max(16, min(tile_n, _round_up(pl.cdiv(N, 2), 16)))
    grid = (pl.cdiv(N, tn),)
    # VMEM (defaults are fine): bf16 tn=512, D=1024 -> ~1 MiB/input tile,
    # double-buffered, plus resident weights -- well under the 16 MiB v5e
    # scoped default; raise vmem_limit_bytes only if tile_n is pushed higher.
    cparams = pltpu.CompilerParams(dimension_semantics=("parallel",))

    out_shape = (
        jax.ShapeDtypeStruct((N, C_pad), jnp.float32),
        jax.ShapeDtypeStruct((N, B_pad), jnp.float32),
    )
    out_specs = (
        pl.BlockSpec((tn, C_pad), lambda i: (i, 0)),
        pl.BlockSpec((tn, B_pad), lambda i: (i, 0)),
    )

    if fused:
        # In a real model the producing layer should emit bf16 directly.
        x_lp = xc.astype(input_dtype)
        kernel = functools.partial(_cosine_fused_kernel, c_pad=C_pad)
        scores_pad, bbox_pad = pl.pallas_call(
            kernel,
            out_shape=out_shape,
            grid=grid,
            in_specs=[
                pl.BlockSpec((tn, D), lambda i: (i, 0)),             # x tile
                pl.BlockSpec((D, C_pad + B_pad), lambda i: (0, 0)),  # fused W (resident)
                pl.BlockSpec((1, C_pad), lambda i: (0, 0)),          # cls bias
                pl.BlockSpec((1, B_pad), lambda i: (0, 0)),          # bbox bias
            ],
            out_specs=out_specs,
            compiler_params=cparams,
        )(x_lp, params["w_fused"], params["bc"], params["bb"])
    else:
        xc_lp = xc.astype(input_dtype)
        xr_lp = xr.astype(input_dtype)
        scores_pad, bbox_pad = pl.pallas_call(
            _cosine_two_stream_kernel,
            out_shape=out_shape,
            grid=grid,
            in_specs=[
                pl.BlockSpec((tn, D), lambda i: (i, 0)),             # xc tile
                pl.BlockSpec((tn, D), lambda i: (i, 0)),             # xr tile
                pl.BlockSpec((D, C_pad), lambda i: (0, 0)),          # cls W (resident)
                pl.BlockSpec((D, B_pad), lambda i: (0, 0)),          # bbox W (resident)
                pl.BlockSpec((1, C_pad), lambda i: (0, 0)),          # cls bias
                pl.BlockSpec((1, B_pad), lambda i: (0, 0)),          # bbox bias
            ],
            out_specs=out_specs,
            compiler_params=cparams,
        )(xc_lp, xr_lp, params["wc_t"], params["wb_t"], params["bc"], params["bb"])

    # Only the column un-pad + the cheap .repeat(1, k) tile stay in XLA.
    scores = scores_pad[:, :C]
    bbox_deltas = jnp.tile(bbox_pad[:, :4], (1, num_bbox_reg_classes))
    return scores, bbox_deltas


# ---------------------------------------------------------------------------
# Reference + test
# ---------------------------------------------------------------------------

def _reference(xc, xr, cls_w, cls_b, bbox_w, bbox_b, num_bbox_reg_classes, scale):
    xc_n = xc / (jnp.linalg.norm(xc, axis=1, keepdims=True) + 1e-5)
    w_n = cls_w / (jnp.linalg.norm(cls_w, axis=1, keepdims=True) + 1e-5)
    scores = scale * (xc_n @ w_n.T + cls_b)
    bbox = xr @ bbox_w.T + bbox_b
    return scores, jnp.tile(bbox, (1, num_bbox_reg_classes))


if __name__ == "__main__":
    key = jax.random.PRNGKey(0)
    k_xc, k_xr, k_wc, k_wb = jax.random.split(key, 4)

    # small shapes: N proposals, representation_size D, num_classes C
    # (N=20 deliberately exercises the ragged last row-tile)
    N, D, C = 20, 32, 8
    NUM_BBOX_REG = 2        # cfg.MODEL.CLS_AGNOSTIC_BBOX_REG = True
    SCALE = 20.0

    xc = jax.random.normal(k_xc, (N, D), dtype=jnp.float32)
    xr = jax.random.normal(k_xr, (N, D), dtype=jnp.float32)

    # parameter init matching the module's __init__ (biases = 0)
    cls_w = 0.01 * jax.random.normal(k_wc, (C, D), dtype=jnp.float32)
    cls_b = jnp.zeros((C,), dtype=jnp.float32)
    bbox_w = 0.001 * jax.random.normal(k_wb, (4, D), dtype=jnp.float32)
    bbox_b = jnp.zeros((4,), dtype=jnp.float32)

    params = preprocess_params(cls_w, cls_b, bbox_w, bbox_b, scale=SCALE)

    # --- two-stream path (xc != xr) ---
    scores, bbox_deltas = fpn_cosine_predictor(
        xc, xr, params, num_bbox_reg_classes=NUM_BBOX_REG)
    jax.block_until_ready((scores, bbox_deltas))

    ref_scores, ref_bbox = _reference(
        xc, xr, cls_w, cls_b, bbox_w, bbox_b, NUM_BBOX_REG, SCALE)
    assert scores.shape == (N, C)
    assert bbox_deltas.shape == (N, 4 * NUM_BBOX_REG)
    # bf16 MXU inputs + approx (EUP) reciprocal -> loosened tolerances
    assert jnp.allclose(scores, ref_scores, atol=2e-1, rtol=5e-2)
    assert jnp.allclose(bbox_deltas, ref_bbox, atol=1e-3, rtol=5e-2)

    # --- fused single-stream path (xc is xr) ---
    scores2, bbox2 = fpn_cosine_predictor(
        xc, xc, params, num_bbox_reg_classes=NUM_BBOX_REG)
    jax.block_until_ready((scores2, bbox2))
    ref_scores2, ref_bbox2 = _reference(
        xc, xc, cls_w, cls_b, bbox_w, bbox_b, NUM_BBOX_REG, SCALE)
    assert jnp.allclose(scores2, ref_scores2, atol=2e-1, rtol=5e-2)
    assert jnp.allclose(bbox2, ref_bbox2, atol=1e-3, rtol=5e-2)

    # TODO(synk): the `xr is None` branch iterates FPN feature maps and uses a
    # `self.scale` attribute the module never defines; only the (xc, xr) branch
    # is implemented here.
    print("KERNEL_OK")
</pallas_src>

<mosaic_0001>
module attributes {stable_mosaic.version = 11 : i64} {
  func.func @_cosine_two_stream_kernel(%arg0: i32, %arg1: memref<16x32xbf16, #tpu.memory_space<vmem>>, %arg2: memref<16x32xbf16, #tpu.memory_space<vmem>>, %arg3: memref<32x128xbf16, #tpu.memory_space<vmem>>, %arg4: memref<32x128xbf16, #tpu.memory_space<vmem>>, %arg5: memref<1x128xf32, #tpu.memory_space<vmem>>, %arg6: memref<1x128xf32, #tpu.memory_space<vmem>>, %arg7: memref<16x128xf32, #tpu.memory_space<vmem>>, %arg8: memref<16x128xf32, #tpu.memory_space<vmem>>) attributes {dimension_semantics = [#tpu.dimension_semantics<parallel>], iteration_bounds = array<i64: 2>, scalar_prefetch = 0 : i64, scratch_operands = 0 : i64, tpu.core_type = #tpu.core_type<tc>, window_params = [{transform_indices = @transform_0, window_bounds = array<i64: 16, 32>}, {transform_indices = @transform_1, window_bounds = array<i64: 16, 32>}, {pipeline_mode = #tpu.pipeline_mode<synchronous>, transform_indices = @transform_2, window_bounds = array<i64: 32, 128>}, {pipeline_mode = #tpu.pipeline_mode<synchronous>, transform_indices = @transform_3, window_bounds = array<i64: 32, 128>}, {pipeline_mode = #tpu.pipeline_mode<synchronous>, transform_indices = @transform_4, window_bounds = array<i64: 1, 128>}, {pipeline_mode = #tpu.pipeline_mode<synchronous>, transform_indices = @transform_5, window_bounds = array<i64: 1, 128>}, {transform_indices = @transform_6, window_bounds = array<i64: 16, 128>}, {transform_indices = @transform_7, window_bounds = array<i64: 16, 128>}]} {
    %c0 = arith.constant 0 : index
    %c0_0 = arith.constant 0 : index
    %0 = vector.load %arg1[%c0, %c0_0] : memref<16x32xbf16, #tpu.memory_space<vmem>>, vector<16x32xbf16>
    %1 = arith.extf %0 : vector<16x32xbf16> to vector<16x32xf32>
    %2 = arith.mulf %1, %1 : vector<16x32xf32>
    %cst = arith.constant dense<0.000000e+00> : vector<16xf32>
    %3 = vector.multi_reduction <add>, %2, %cst [1] : vector<16x32xf32> to vector<16xf32>
    %4 = vector.shape_cast %3 : vector<16xf32> to vector<16x1xf32>
    %5 = math.sqrt %4 : vector<16x1xf32>
    %cst_1 = arith.constant 9.99999974E-6 : f32
    %6 = vector.broadcast %cst_1 : f32 to vector<16x1xf32>
    %7 = arith.addf %5, %6 : vector<16x1xf32>
    %8 = tpu.reciprocal %7 {approx = true} : vector<16x1xf32> -> vector<16x1xf32>
    %c0_2 = arith.constant 0 : index
    %c0_3 = arith.constant 0 : index
    %9 = vector.load %arg3[%c0_2, %c0_3] : memref<32x128xbf16, #tpu.memory_space<vmem>>, vector<32x128xbf16>
    %cst_4 = arith.constant dense<0.000000e+00> : vector<16x128xf32>
    %10 = tpu.matmul %0, %9, %cst_4 {dimension_numbers = #tpu.dot_dimension_numbers<[1], [0], [0], [1], [0, 0, 1, 1], [], []>} : vector<16x32xbf16>, vector<32x128xbf16>, vector<16x128xf32> -> vector<16x128xf32>
    %11 = vector.broadcast %8 : vector<16x1xf32> to vector<16x128xf32>
    %12 = arith.mulf %10, %11 : vector<16x128xf32>
    %c0_5 = arith.constant 0 : index
    %c0_6 = arith.constant 0 : index
    %13 = vector.load %arg5[%c0_5, %c0_6] : memref<1x128xf32, #tpu.memory_space<vmem>>, vector<1x128xf32>
    %14 = vector.broadcast %13 : vector<1x128xf32> to vector<16x128xf32>
    %15 = arith.addf %12, %14 : vector<16x128xf32>
    %c0_7 = arith.constant 0 : index
    %c0_8 = arith.constant 0 : index
    %16 = vector.load %arg7[%c0_7, %c0_8] : memref<16x128xf32, #tpu.memory_space<vmem>>, vector<16x128xf32>
    tpu.vector_store %arg7[%c0_7, %c0_8], %15 {strides = array<i32>} : memref<16x128xf32, #tpu.memory_space<vmem>>, vector<16x128xf32>,
    %c0_9 = arith.constant 0 : index
    %c0_10 = arith.constant 0 : index
    %17 = vector.load %arg2[%c0_9, %c0_10] : memref<16x32xbf16, #tpu.memory_space<vmem>>, vector<16x32xbf16>
    %c0_11 = arith.constant 0 : index
    %c0_12 = arith.constant 0 : index
    %18 = vector.load %arg4[%c0_11, %c0_12] : memref<32x128xbf16, #tpu.memory_space<vmem>>, vector<32x128xbf16>
    %cst_13 = arith.constant dense<0.000000e+00> : vector<16x128xf32>
    %19 = tpu.matmul %17, %18, %cst_13 {dimension_numbers = #tpu.dot_dimension_numbers<[1], [0], [0], [1], [0, 0, 1, 1], [], []>} : vector<16x32xbf16>, vector<32x128xbf16>, vector<16x128xf32> -> vector<16x128xf32>
    %c0_14 = arith.constant 0 : index
    %c0_15 = arith.constant 0 : index
    %20 = vector.load %arg6[%c0_14, %c0_15] : memref<1x128xf32, #tpu.memory_space<vmem>>, vector<1x128xf32>
    %21 = vector.broadcast %20 : vector<1x128xf32> to vector<16x128xf32>
    %22 = arith.addf %19, %21 : vector<16x128xf32>
    %c0_16 = arith.constant 0 : index
    %c0_17 = arith.constant 0 : index
    %23 = vector.load %arg8[%c0_16, %c0_17] : memref<16x128xf32, #tpu.memory_space<vmem>>, vector<16x128xf32>
    tpu.vector_store %arg8[%c0_16, %c0_17], %22 {strides = array<i32>} : memref<16x128xf32, #tpu.memory_space<vmem>>, vector<16x128xf32>,
    return
  }
  func.func @transform_0(%arg0: i32) -> (i32, i32) {
    %c0_i32 = arith.constant 0 : i32
    %c0_i32_0 = arith.constant 0 : i32
    return %arg0, %c0_i32 : i32, i32
  }
  func.func @transform_1(%arg0: i32) -> (i32, i32) {
    %c0_i32 = arith.constant 0 : i32
    %c0_i32_0 = arith.constant 0 : i32
    return %arg0, %c0_i32 : i32, i32
  }
  func.func @transform_2(%arg0: i32) -> (i32, i32) {
    %c0_i32 = arith.constant 0 : i32
    %c0_i32_0 = arith.constant 0 : i32
    %c0_i32_1 = arith.constant 0 : i32
    return %c0_i32, %c0_i32_0 : i32, i32
  }
  func.func @transform_3(%arg0: i32) -> (i32, i32) {
    %c0_i32 = arith.constant 0 : i32
    %c0_i32_0 = arith.constant 0 : i32
    %c0_i32_1 = arith.constant 0 : i32
    return %c0_i32, %c0_i32_0 : i32, i32
  }
  func.func @transform_4(%arg0: i32) -> (i32, i32) {
    %c0_i32 = arith.constant 0 : i32
    %c0_i32_0 = arith.constant 0 : i32
    %c0_i32_1 = arith.constant 0 : i32
    return %c0_i32, %c0_i32_0 : i32, i32
  }
  func.func @transform_5(%arg0: i32) -> (i32, i32) {
    %c0_i32 = arith.constant 0 : i32
    %c0_i32_0 = arith.constant 0 : i32
    %c0_i32_1 = arith.constant 0 : i32
    return %c0_i32, %c0_i32_0 : i32, i32
  }
  func.func @transform_6(%arg0: i32) -> (i32, i32) {
    %c0_i32 = arith.constant 0 : i32
    %c0_i32_0 = arith.constant 0 : i32
    return %arg0, %c0_i32 : i32, i32
  }
  func.func @transform_7(%arg0: i32) -> (i32, i32) {
    %c0_i32 = arith.constant 0 : i32
    %c0_i32_0 = arith.constant 0 : i32
    return %arg0, %c0_i32 : i32, i32
  }
}

</mosaic_0001>

<bundles_post_ra>
// kernel: tpu_custom_call.1
= control target key start
LH: loop header
LB: loop body
LE: loop exit
PB: predicated region body
PF: predicated region fallthrough
CT: control target
= control target key end

     0   :  { %13 = vsyncpa [#allocation3], 0  ;;  %s1596_s0 = inlined_call_operand.hbm [shape: bf16[20,32], index: 0, kind: input, shape index: {}]   ;;  %s1597_s1 = inlined_call_operand.hbm [shape: bf16[20,32], index: 1, kind: input, shape index: {}]   ;;  %s1598_s2 = inlined_call_operand.hbm [shape: bf16[32,128], index: 2, kind: input, shape index: {}]   ;;  %s1599_s3 = inlined_call_operand.hbm [shape: bf16[32,128], index: 3, kind: input, shape index: {}]   ;;  %s1600_s4 = inlined_call_operand.vmem [shape: f32[1,128], index: 4, kind: input, shape index: {}]   ;;  %s1601_s5 = inlined_call_operand.vmem [shape: f32[1,128], index: 5, kind: input, shape index: {}]   ;;  %s1602_s6 = inlined_call_operand.hbm [shape: f32[20,128], index: 6, kind: output, shape index: {0}]   ;;  %s1603_s7 = inlined_call_operand.hbm [shape: f32[20,128], index: 7, kind: output, shape index: {1}]  }
   0x1   :  { %15 = vsyncpa [#allocation3 + $0x1], 0 }
   0x2   :  { %16 = vsyncpa [#allocation6], 0 }
   0x3   :  { %18 = vsyncpa [#allocation6 + $0x1], 0 }
   0x4   :  { %19 = vsyncpa [#allocation9], 0 }
   0x5   :  { %20 = vsyncpa [#allocation4], 0 }
   0x6   :  { %22 = vsyncpa [#allocation4 + $0x1], 0 }
   0x7   :  { %23 = vsyncpa [#allocation12], 0 }
   0x8   :  { %25 = vsyncpa [#allocation12 + $0x1], 0  ;;  %s1241_s24 = smov 0   ;;  %s1243_s25 = smov 0  }
   0x9   :  { %s1245_s26 = smov 0   ;;  %s1247_s27 = smov 0  }
   0xa LB: > { %s1262_s28 = sadd.s32 4294967295, %s1181_s27   ;;  %s789_s29 = sadd.s32 4294967294, %s1181_s27   ;;  %s1181_s27 = sphi %s1247_s27, %s1631_s27   ;;  %s1177_s26 = sphi %s1245_s26, %s1635_s26   ;;  %s1173_s25 = sphi %s1243_s25, %s1634_s25   ;;  %s1169_s24 = sphi %s1241_s24, %s1633_s24  }
   0xb   : > { %s1266_s30 = sadd.s32 1, %s1181_s27   ;;  %s38_s8 = sadd.s32 1, %s1177_s26 }
   0xc   : > { %1610 = sst [smem:[#allocation19_spill]] %s1266_s30  ;;  %s35_s9 = ssub.s32 %s1181_s27, %s1266_s30 }
   0xd   : > { %p45_p0 = scmp.ne.s32.totalorder %s1177_s26, %s1173_s25  ;;  %p36_p1 = scmp.eq.s32.totalorder %s35_s9, 0 }
   0xe   : > { %p46_p2 = scmp.eq.s32.totalorder %s1181_s27, 0  ;;  %p51_p3 = scmp.ne.s32.totalorder %s1173_s25, %s1169_s24 }
   0xf   : > { %p1604_p4 = scmp.eq.s32.totalorder %s1262_s28, 0  ;;  %p185_p7 = scmp.eq.s32.totalorder %s1262_s28, 1 }
  0x10   : > { %s1278_s10 = scalar_select %p36_p1, %s1177_s26, %s38_s8  }
  0x11   : > { %p1280_p5 = por %p46_p2, %p45_p0  ;;  %p1286_p6 = por %p1604_p4, %p51_p3 }
  0x12   : > { %1611 = sst [smem:[#allocation20_spill]] %s1278_s10  ;;  %p191_p8 = scmp.eq.s32.totalorder %s789_s29, 1 }
  0x13   : > { %s1612_s11 = scalar_select %p1280_p5, 1, 0 }
  0x14   : > { %s1613_s12 = scalar_select %p1286_p6, 1, 0 }
  0x15   : > { %p790_p9 = scmp.ge.s32.totalorder %s1181_s27, 1  ;;  %p224_p10 = scmp.lt.s32.totalorder %s1181_s27, 3 }
  0x16   : > { %p1293_p11 = por %p185_p7, %p45_p0  ;;  %p1297_p12 = por %p191_p8, %p51_p3 }
  0x17   : > { %p1301_p13 = pnand %p790_p9, %p224_p10  ;;  %s1183_s16 = smov [#allocation7]  }
  0x18   : > { %s1614_s13 = scalar_select %p1293_p11, 1, 0 }
  0x19   : > { %s1615_s14 = scalar_select %p1297_p12, 1, 0 }
  0x1a   : > { %s1617_s15 = scalar_select %p1301_p13, 1, 0 }
  0x1b   : > { %1616 = sst [smem:[#allocation21_spill]] %s1615_s14  ;;  %p879_p1 = pneg %p1301_p13 }
  0x1c   : > { %s236_s17 = sshll.u32 %s1183_s16, 4  ;;  %s1184_s19 = smov [#allocation8]   ;;  %s237_s17 = int_to_ptr.vmem [resolvable:$true] %s236_s17 }
  0x1d   : > { %p1309_p2 = pnand %p879_p1, %p1604_p4  ;;  %s249_s20 = sshll.u32 %s1184_s19, 4  ;;  %s1313_s20 = int_to_ptr.vmem [resolvable:$true] %s249_s20 }
  0x1e   : > { %s959_s23 = scalar_lea.hbm %s1598_s2, 256 }
  0x1f   : > { %p960_p0 = scmp.ne.s32.totalorder %s1598_s2, %s959_s23  ;;  %p961_p3 = pneg %p1309_p2 }
  0x20   : > { %p966_p9 = scmp.lt.u32.totalorder %s959_s23, %s1598_s2 }
  0x21   : > { %p962_p7 = pnand %p961_p3, %p960_p0 }
  0x23   : > { %p963_p8 = pneg %p962_p7 }
  0x25   : > { %p968_p10 = pnand %p966_p9, %p963_p8 }
  0x27   : > { %971 = shalt.err (!%p968_p10)
}
  0x28   : > { %s972_s19 = scalar_lea.vmem %s237_s17, 256  ;;  %p980_p11 = scmp.lt.s32.totalorder %s237_s17, %s237_s17 }
  0x29   : > { %p973_p1 = scmp.ne.s32.totalorder %s237_s17, %s972_s19  ;;  %p981_p6 = scmp.lt.s32.totalorder %s972_s19, %s972_s19 }
  0x2b   : > { %p975_p4 = pnand %p973_p1, %p961_p3  ;;  %p982_p13 = por %p981_p6, %p980_p11 }
  0x2d   : > { %p976_p12 = pneg %p975_p4 }
  0x2f   : > { %p983_p5 = pnand %p982_p13, %p976_p12 }
  0x31   : > { %986 = shalt.err (!%p983_p5)
}
  0x32   : > { %s1185_s21 = smov 64   ;;  %s1186_s22 = smov 4  }
  0x33   : > { %882 = dma.hbm_to_vmem [thread:$0]  (!%p1309_p2), %s1598_s2, 256, %s237_s17, [#allocation6], %s1185_s21, %s1185_s21, %s1186_s22  }
  0x34   : > { %s987_s16 = scalar_lea.hbm %s1599_s3, 256 }
  0x35   : > { %p988_p4 = scmp.ne.s32.totalorder %s1599_s3, %s987_s16  ;;  %p994_p11 = scmp.lt.u32.totalorder %s987_s16, %s1599_s3 }
  0x37   : > { %p990_p5 = pnand %p988_p4, %p961_p3 }
  0x39   : > { %p991_p6 = pneg %p990_p5 }
  0x3b   : > { %p996_p12 = pnand %p994_p11, %p991_p6 }
  0x3d   : > { %999 = shalt.err (!%p996_p12)
}
  0x3e   : > { %s1000_s17 = scalar_lea.vmem %s1313_s20, 256  ;;  %p1008_p8 = scmp.lt.s32.totalorder %s1313_s20, %s1313_s20 }
  0x3f   : > { %p1001_p13 = scmp.ne.s32.totalorder %s1313_s20, %s1000_s17  ;;  %p1009_p9 = scmp.lt.s32.totalorder %s1000_s17, %s1000_s17 }
  0x41   : > { %p1003_p0 = pnand %p1001_p13, %p961_p3  ;;  %p1010_p10 = por %p1009_p9, %p1008_p8 }
  0x43   : > { %p1004_p7 = pneg %p1003_p0 }
  0x45   : > { %p1011_p1 = pnand %p1010_p10, %p1004_p7 }
  0x47   : > { %1014 = shalt.err (!%p1011_p1)
}
  0x48   : > { %885 = dma.hbm_to_vmem [thread:$0]  (!%p1309_p2), %s1599_s3, 256, %s1313_s20, [#allocation9], %s1185_s21, %s1185_s21, %s1186_s22  }
  0x49   : > { %p793_p4 = scmp.ge.s32.totalorder %s1181_s27, 2 }
  0x4a   : > { %p1619_p3 = scmp.ne.s32.totalorder (!%p793_p4), %s1612_s11, 0 }
  0x4b   : > { %265 = sbr.rel (%p793_p4) target bundleno = 154 (0x9a), region = 32 }
  0x52   : > { %268 = sbr.rel (!%p1619_p3) target bundleno = 117 (0x75), region = 36  ;;  %s269_s14 = sand.u32 (%p1619_p3), 1, %s1177_s26  }
  0x53   : > { %s795_s23 = sshll.u32 (%p1619_p3), %s1181_s27, 1  ;;  %s794_s29 = sshll.u32 (%p1619_p3), %s269_s14, 3 }
  0x54   : > { %s275_s8 = ssub.s32 (%p1619_p3), 3, %s795_s23  ;;  %s1372_s21 = scalar_lea.sflag (%p1619_p3), [#allocation3], %s269_s14 }
  0x55   : > { %p276_p5 = scmp.lt.s32.totalorder (%p1619_p3), %s275_s8, 2  ;;  %s273_s22 = scalar_lea.vmem (%p1619_p3), [#allocation2], %s794_s29 }
  0x59   : > { %s1637_s8 = smov (!%p276_p5, %s275_s8), 2 }
  0x5a   : > { %s1369_s18 = sshll.u32 %s1637_s8, 6 }
  0x5b   : > { %s280_s20 = ssub.s32 128, %s1369_s18 }
  0x5c   : > { %281 = vsyncadd %s1372_s21, %s280_s20  ;;  %p797_p2 = scmp.ne.s32.totalorder %s1369_s18, 0  ;;  %s841_s9 = sshll.u32 %s1181_s27, 7 }
  0x5d   : > { %s1380_s17 = scalar_lea.hbm %s1596_s0, %s841_s9  ;;  %s286_s30 = sshll.u32 %s273_s22, 4  ;;  %s1382_s30 = int_to_ptr.vmem [resolvable:$true] %s286_s30 }
  0x5e   : > { %s1015_s10 = scalar_lea.hbm %s1380_s17, %s1369_s18  ;;  %s1019_s29 = scalar_lea.hbm %s1596_s0, 192 }
  0x5f   : > { %p1016_p6 = scmp.ne.s32.totalorder %s1380_s17, %s1015_s10  ;;  %p1020_p13 = scmp.lt.u32.totalorder %s1380_s17, %s1596_s0 }
  0x60   : > { %p1021_p0 = scmp.lt.u32.totalorder %s1019_s29, %s1015_s10  ;;  %p1023_p8 = scmp.lt.u32.totalorder %s1015_s10, %s1380_s17 }
  0x61   : > { %p1017_p11 = pnand %p1016_p6, %p797_p2 }
  0x62   : > { %p1022_p7 = por %p1021_p0, %p1020_p13 }
  0x63   : > { %p1018_p12 = pneg %p1017_p11 }
  0x64   : > { %p1024_p9 = por %p1023_p8, %p1022_p7 }
  0x66   : > { %p1025_p10 = pnand %p1024_p9, %p1018_p12 }
  0x68   : > { %1028 = shalt.err (!%p1025_p10)
}
  0x69   : > { %s1029_s22 = scalar_lea.vmem %s1382_s30, %s1369_s18  ;;  %s1187_s9 = smov [#allocation2]  }
  0x6a   : > { %p1030_p1 = scmp.ne.s32.totalorder %s1382_s30, %s1029_s22  ;;  %s1033_s16 = sshll.u32 %s1187_s9, 4  ;;  %s1034_s16 = int_to_ptr.vmem [resolvable:$false] %s1033_s16 }
  0x6b   : > { %s1035_s19 = scalar_lea.vmem %s1034_s16, 256  ;;  %p1036_p6 = scmp.lt.s32.totalorder %s1382_s30, %s1034_s16 }
  0x6c   : > { %p1031_p3 = pnand %p1030_p1, %p797_p2  ;;  %p1037_p11 = scmp.lt.s32.totalorder %s1035_s19, %s1029_s22 }
  0x6e   : > { %p1032_p5 = pneg %p1031_p3  ;;  %p1038_p13 = por %p1037_p11, %p1036_p6 }
  0x70   : > { %p1039_p0 = pnand %p1038_p13, %p1032_p5 }
  0x72   : > { %1042 = shalt.err (!%p1039_p0)
}
  0x73   : > { %s1188_s10 = smov 64   ;;  %s1189_s14 = smov 4  }
  0x74   : > { %292 = dma.hbm_to_vmem [thread:$0]  (%p797_p2), %s1380_s17, %s1369_s18, %s1382_s30, %s1372_s21, %s1188_s10, %s1188_s10, %s1189_s14  }
  0x75 PF: > { %p1620_p12 = scmp.ne.s32.totalorder %s1612_s11, 0 }
  0x76   : > { %s296_s23 = sand.u32 (%p1620_p12), 1, %s1181_s27   ;;  %s298_s29 = sand.u32 (%p1620_p12), 1, %s1177_s26  }
  0x77   : > { %295 = sbr.rel (!%p1620_p12) target bundleno = 154 (0x9a), region = 40  ;;  %s801_s8 = sshll.u32 (%p1620_p12), %s298_s29, 3 }
  0x78   : > { %s802_s20 = sshll.u32 (%p1620_p12), %s1181_s27, 1  ;;  %s1417_s19 = scalar_lea.sflag (%p1620_p12), [#allocation6], %s296_s23 }
  0x79   : > { %s302_s22 = ssub.s32 (%p1620_p12), 3, %s802_s20  ;;  %s300_s18 = scalar_lea.vmem (%p1620_p12), [#allocation5], %s801_s8 }
  0x7a   : > { %p303_p7 = scmp.lt.s32.totalorder (%p1620_p12), %s302_s22, 2 }
  0x7e   : > { %s1639_s22 = smov (!%p303_p7, %s302_s22), 2 }
  0x7f   : > { %s1414_s9 = sshll.u32 %s1639_s22, 6 }
  0x80   : > { %s307_s16 = ssub.s32 128, %s1414_s9 }
  0x81   : > { %308 = vsyncadd %s1417_s19, %s307_s16  ;;  %p804_p2 = scmp.ne.s32.totalorder %s1414_s9, 0  ;;  %s842_s11 = sshll.u32 %s1181_s27, 7 }
  0x82   : > { %s1425_s30 = scalar_lea.hbm %s1597_s1, %s842_s11  ;;  %s313_s10 = sshll.u32 %s300_s18, 4  ;;  %s1427_s10 = int_to_ptr.vmem [resolvable:$true] %s313_s10 }
  0x83   : > { %s1043_s14 = scalar_lea.hbm %s1425_s30, %s1414_s9  ;;  %s1047_s8 = scalar_lea.hbm %s1597_s1, 192 }
  0x84   : > { %p1044_p8 = scmp.ne.s32.totalorder %s1425_s30, %s1043_s14  ;;  %p1048_p1 = scmp.lt.u32.totalorder %s1425_s30, %s1597_s1 }
  0x85   : > { %p1049_p3 = scmp.lt.u32.totalorder %s1047_s8, %s1043_s14  ;;  %p1051_p6 = scmp.lt.u32.totalorder %s1043_s14, %s1425_s30 }
  0x86   : > { %p1045_p9 = pnand %p1044_p8, %p804_p2 }
  0x87   : > { %p1050_p5 = por %p1049_p3, %p1048_p1 }
  0x88   : > { %p1046_p10 = pneg %p1045_p9 }
  0x89   : > { %p1052_p11 = por %p1051_p6, %p1050_p5 }
  0x8b   : > { %p1053_p13 = pnand %p1052_p11, %p1046_p10 }
  0x8d   : > { %1056 = shalt.err (!%p1053_p13)
}
  0x8e   : > { %s1057_s16 = scalar_lea.vmem %s1427_s10, %s1414_s9  ;;  %s1190_s18 = smov [#allocation5]  }
  0x8f   : > { %p1058_p0 = scmp.ne.s32.totalorder %s1427_s10, %s1057_s16  ;;  %s1061_s11 = sshll.u32 %s1190_s18, 4  ;;  %s1062_s11 = int_to_ptr.vmem [resolvable:$false] %s1061_s11 }
  0x90   : > { %s1063_s21 = scalar_lea.vmem %s1062_s11, 256  ;;  %p1064_p8 = scmp.lt.s32.totalorder %s1427_s10, %s1062_s11 }
  0x91   : > { %p1059_p12 = pnand %p1058_p0, %p804_p2  ;;  %p1065_p9 = scmp.lt.s32.totalorder %s1063_s21, %s1057_s16 }
  0x93   : > { %p1060_p7 = pneg %p1059_p12  ;;  %p1066_p1 = por %p1065_p9, %p1064_p8 }
  0x95   : > { %p1067_p3 = pnand %p1066_p1, %p1060_p7 }
  0x97   : > { %1070 = shalt.err (!%p1067_p3)
}
  0x98   : > { %s1191_s17 = smov 64   ;;  %s1192_s14 = smov 4  }
  0x99   : > { %319 = dma.hbm_to_vmem [thread:$0]  (%p804_p2), %s1425_s30, %s1414_s9, %s1427_s10, %s1417_s19, %s1191_s17, %s1191_s17, %s1192_s14  }
  0x9a PF: > { %p1621_p10 = scmp.ne.s32.totalorder %s1617_s15, 0 }
  0x9b   : > { %s1457_s23 = sand.u32 (!%p1621_p10), 1, %s1173_s25   ;;  %p1622_p5 = scmp.ne.s32.totalorder (!%p1621_p10), %s1613_s12, 0 }
  0x9c   : > { %325 = sbr.rel (%p1621_p10) target bundleno = 467 (0x1d3), region = 44  ;;  %s809_s29 = sshll.u32 (!%p1621_p10), %s1457_s23, 3 }
  0x9d   : > { %s328_s8 = scalar_lea.sflag (!%p1621_p10), [#allocation3], %s1457_s23  ;;  %s331_s20 = scalar_lea.vmem (!%p1621_p10), [#allocation2], %s809_s29 }
  0xa3   : > { %1144 = dma.done.wait (%p1622_p5), %s328_s8, 128  }
  0xa4   : > { %1146 = vsyncadd (%p1622_p5), %s328_s8, 4294967168  ;;  %s336_s9 = sand.u32 1, %s1262_s28   ;;  %s340_s15 = scalar_lea.vmem [#allocation5], %s809_s29 }
  0xa5   : > { %s337_s19 = scalar_lea.sflag [#allocation6], %s336_s9 }
  0xa6   : > { %1148 = dma.done.wait (%p1622_p5), %s337_s19, 128  }
  0xa7   : > { %1150 = vsyncadd (%p1622_p5), %s337_s19, 4294967168  ;;  %p1623_p2 = scmp.eq.s32.totalorder %s1262_s28, 0 }
  0xa9   : > { %1152 = dma.done.wait (%p1623_p2), [#allocation6], 256   ;;  %p1624_p6 = pmov %p1623_p2 }
  0xaa   : > { %p1625_p11 = pmov %p1623_p2 }
  0xab   : > { %1154 = vsyncadd (%p1624_p6), [#allocation6], 4294967040 }
  0xac   : > { %1156 = dma.done.wait (%p1625_p11), [#allocation9], 256   ;;  %p1626_p13 = pmov %p1623_p2 }
  0xad   : > { %v1193_v0 = vmov 0.0   ;;  %vm1194_vm0 = vmmov 0   ;;  %v944_v1 = vld [vmem:[#allocation7] sm:$0xff]   ;;  %v945_v2 = vld [vmem:[#allocation8] sm:$0xff]   ;;  %v946_v3 = vld [vmem:[#allocation7 + $0x8] sm:$0xff]   ;;  %vm416_vm1 = vcmask 261120  }
  0xae   : > { %1158 = vsyncadd (%p1626_p13), [#allocation9], 4294967040  ;;  %851 = vmatprep.subr.bf16.mxu0 %v1193_v0  ;;  %859 = vmatprep.subr.bf16.mxu1 %v1193_v0  ;;  %v947_v4 = vld [vmem:[#allocation8 + $0x8] sm:$0xff]   ;;  %v410_v5 = vld [vmem:[%s331_s20] sm:$0xff]   ;;  %s813_s12 = sshll.u32 %s1457_s23, 4  ;;  %s596_s21 = scalar_lea.sflag [#allocation4], %s1457_s23 }
  0xaf   : > { %855 = vmatprep.mubr.msk.bf16.mxu0 %vm1194_vm0, %v1193_v0  ;;  %863 = vmatprep.mubr.msk.bf16.mxu1 %vm1194_vm0, %v1193_v0  ;;  %v412_v6 = vunpack.c.l.bf16 %v410_v5  ;;  %v413_v7 = vunpack.c.h.bf16 %v410_v5  ;;  %v949_v8 = vld [vmem:[%s340_s15] sm:$0xff]   ;;  %v820_v27 = vld [vmem:[%s1601_s5] ss:$0 sm:$0xff]  ;;  %s1485_s18 = scalar_lea.vmem [#allocation11], %s813_s12  ;;  %s381_s11 = scalar_lea.vmem [#allocation10], %s813_s12 }
  0xb0   : > { %852 = vmatpush3.bf16.msra.mxu0 %v944_v1  ;;  %860 = vmatpush3.bf16.msra.mxu1 %v945_v2  ;;  %v819_v30 = vld [vmem:[%s1600_s4] ss:$0 sm:$0xff]  ;;  %s601_s17 = scalar_lea.sflag [#allocation12], %s1457_s23  ;;  %p1627_p0 = scmp.ne.s32.totalorder %s1614_s13, 0 }
  0xb1   : > { %853 = vmatprep.subr.bf16.mxu0 %v1193_v0  ;;  %861 = vmatprep.subr.bf16.mxu1 %v1193_v0  ;;  %v414_v9 = vmul.f32 %v412_v6, %v412_v6  ;;  %v415_v10 = vmul.f32 %v413_v7, %v413_v7  ;;  %s827_s14 = sshll.u32 (%p1627_p0), %s1262_s28, 1 }
  0xb2   : > { %s609_s29 = ssub.s32 (%p1627_p0), 3, %s827_s14 }
  0xb3   : > { %v417_v11 = vsel %vm416_vm1, %v414_v9, 0.0  ;;  %v420_v12 = vsel %vm416_vm1, %v415_v10, 0.0  ;;  %p610_p12 = scmp.lt.s32.totalorder (%p1627_p0), %s609_s29, 2 }
  0xb4   : > { %854 = vmatpush3.bf16.msra.mxu0 %v946_v3  ;;  %862 = vmatpush3.bf16.msra.mxu1 %v947_v4 }
  0xb5   : > { %418 = vadd.xlane.f32.xlu0 %v417_v11 }
  0xb7   : > { %856 = vmatmul.mubr.msk.bf16.vlgmr.msra.gmra.mrb[0].mxu0 %vm416_vm1, %v410_v5  ;;  %864 = vmatmul.mubr.msk.bf16.vlgmr.msra.gmra.mrb[0].mxu1 %vm416_vm1, %v949_v8 }
  0xb9   : > { %421 = vadd.xlane.f32.xlu0 %v420_v12 }
 0x142   : > { %v419_v13 = vpop.xlane.xlu0 %418 }
 0x143   : > { %951 = vrsqrt.f32 %v419_v13  ;;  %vm425_vm2 = vcmp.eq.f32.partialorder %v419_v13, inf  ;;  %v428_v19 = vand.u32 2147483648, %v419_v13  ;;  %vm427_vm4 = vcmp.eq.f32.partialorder %v419_v13, 0.0 }
 0x146   : > { %v422_v14 = vpop.xlane.xlu0 %421 }
 0x147   : > { %953 = vrsqrt.f32 %v422_v14  ;;  %vm432_vm3 = vcmp.eq.f32.partialorder %v422_v14, inf  ;;  %v435_v21 = vand.u32 2147483648, %v422_v14  ;;  %vm434_vm5 = vcmp.eq.f32.partialorder %v422_v14, 0.0 }
 0x14d   : > { %v952_v15 = vpop.eup %951 }
 0x14e   : > { %v424_v17 = vmul.f32 %v952_v15, %v419_v13 }
 0x150   : > { %v426_v20 = vsel %vm425_vm2, %v419_v13, %v424_v17 }
 0x151   : > { %v954_v16 = vpop.eup %953  ;;  %v429_v23 = vsel %vm427_vm4, %v428_v19, %v426_v20 }
 0x152   : > { %v431_v18 = vmul.f32 %v954_v16, %v422_v14  ;;  %v437_v25 = vadd.f32 1e-05, %v429_v23 }
 0x154   : > { %v433_v22 = vsel %vm432_vm3, %v422_v14, %v431_v18  ;;  %955 = vrcp.f32 %v437_v25 }
 0x155   : > { %v436_v24 = vsel %vm434_vm5, %v435_v21, %v433_v22 }
 0x156   : > { %v438_v26 = vadd.f32 1e-05, %v436_v24 }
 0x158   : > { %957 = vrcp.f32 %v438_v26 }
 0x15e   : > { %v956_v28 = vpop.eup %955 }
 0x162   : > { %v958_v34 = vpop.eup %957 }
 0x18a   : > { %v499_v29 = vpop.f32.mrb[0].mxu0  ;;  %v586_v32 = vpop.f32.mrb[0].mxu1 }
 0x18b   : > { %v506_v31 = vmul.f32 %v956_v28, %v499_v29  ;;  %v857_v33 = vpop.f32.mrb[1].mxu0  ;;  %v587_v35 = vadd.f32 %v820_v27, %v586_v32  ;;  %v865_v36 = vpop.f32.mrb[1].mxu1  ;;  %607 = sbr.rel (!%p1627_p0) target bundleno = 430 (0x1ae), region = 64 }
 0x18c   : > { %v502_v37 = vpop.f32.mrb[2].mxu0  ;;  %v589_v40 = vpop.f32.mrb[2].mxu1 }
 0x18d   : > { %v515_v38 = vadd.f32 %v819_v30, %v506_v31  ;;  %v507_v39 = vmul.f32 %v958_v34, %v502_v37  ;;  %v858_v41 = vpop.f32.mrb[3].mxu0  ;;  %593 = vst [vmem:[%s1485_s18] sm:$0xff] %v587_v35  ;;  %v590_v42 = vadd.f32 %v820_v27, %v589_v40  ;;  %v866_v43 = vpop.f32.mrb[3].mxu1 }
 0x18f   : > { %517 = vst [vmem:[%s381_s11] sm:$0xff] %v515_v38  ;;  %v516_v44 = vadd.f32 %v819_v30, %v507_v39  ;;  %594 = vst [vmem:[%s1485_s18 + $0x8] sm:$0xff] %v590_v42 }
 0x191   : > { %518 = vst [vmem:[%s381_s11 + $0x8] sm:$0xff] %v516_v44 }
 0x192   : > { %s1641_s29 = smov (!%p610_p12, %s609_s29), 2 }
 0x193   : > { %s1494_s8 = sshll.u32 %s1641_s29, 7 }
 0x194   : > { %s614_s20 = ssub.s32 256, %s1494_s8 }
 0x195   : > { %615 = vsyncadd %s596_s21, %s614_s20  ;;  %p829_p7 = scmp.ne.s32.totalorder %s1494_s8, 0  ;;  %s843_s9 = sshll.u32 %s1262_s28, 8 }
 0x196   : > { %s1504_s12 = scalar_lea.hbm %s1602_s6, %s843_s9  ;;  %s620_s30 = sshll.u32 %s381_s11, 4  ;;  %s1506_s30 = int_to_ptr.vmem [resolvable:$true] %s620_s30 }
 0x197   : > { %s1071_s10 = scalar_lea.vmem %s1506_s30, %s1494_s8  ;;  %s1195_s22 = smov [#allocation10]  }
 0x198   : > { %p1072_p8 = scmp.ne.s32.totalorder %s1506_s30, %s1071_s10  ;;  %s1075_s16 = sshll.u32 %s1195_s22, 4  ;;  %s1076_s16 = int_to_ptr.vmem [resolvable:$false] %s1075_s16 }
 0x199   : > { %s1077_s14 = scalar_lea.vmem %s1076_s16, 512  ;;  %p1078_p3 = scmp.lt.s32.totalorder %s1506_s30, %s1076_s16 }
 0x19a   : > { %p1073_p9 = pnand %p1072_p8, %p829_p7  ;;  %p1079_p10 = scmp.lt.s32.totalorder %s1077_s14, %s1071_s10 }
 0x19c   : > { %p1074_p1 = pneg %p1073_p9  ;;  %p1080_p5 = por %p1079_p10, %p1078_p3 }
 0x19e   : > { %p1081_p2 = pnand %p1080_p5, %p1074_p1 }
 0x1a0   : > { %1084 = shalt.err (!%p1081_p2)
}
 0x1a1   : > { %s1085_s11 = scalar_lea.hbm %s1504_s12, %s1494_s8  ;;  %s1089_s9 = scalar_lea.hbm %s1602_s6, 384 }
 0x1a2   : > { %p1086_p6 = scmp.ne.s32.totalorder %s1504_s12, %s1085_s11  ;;  %p1090_p0 = scmp.lt.u32.totalorder %s1504_s12, %s1602_s6 }
 0x1a3   : > { %p1091_p12 = scmp.lt.u32.totalorder %s1089_s9, %s1085_s11  ;;  %p1093_p9 = scmp.lt.u32.totalorder %s1085_s11, %s1504_s12 }
 0x1a4   : > { %p1087_p11 = pnand %p1086_p6, %p829_p7 }
 0x1a5   : > { %p1092_p8 = por %p1091_p12, %p1090_p0 }
 0x1a6   : > { %p1088_p13 = pneg %p1087_p11 }
 0x1a7   : > { %p1094_p1 = por %p1093_p9, %p1092_p8 }
 0x1a9   : > { %p1095_p3 = pnand %p1094_p1, %p1088_p13 }
 0x1ab   : > { %1098 = shalt.err (!%p1095_p3)
}
 0x1ac   : > { %s1196_s10 = smov 128   ;;  %s1197_s22 = smov 8  }
 0x1ad   : > { %626 = dma.vmem_to_hbm [thread:$0]  (%p829_p7), %s1506_s30, %s1494_s8, %s1504_s12, %s596_s21, %s1196_s10, %s1196_s10, %s1197_s22  }
 0x1ae PF: > { %p1628_p10 = scmp.ne.s32.totalorder %s1614_s13, 0 }
 0x1af   : > { %s833_s16 = sshll.u32 (%p1628_p10), %s1262_s28, 1 }
 0x1b0   : > { %629 = sbr.rel (!%p1628_p10) target bundleno = 467 (0x1d3), region = 68  ;;  %s631_s14 = ssub.s32 (%p1628_p10), 3, %s833_s16 }
 0x1b1   : > { %p632_p5 = scmp.lt.s32.totalorder (%p1628_p10), %s631_s14, 2 }
 0x1b7   : > { %s1643_s14 = smov (!%p632_p5, %s631_s14), 2 }
 0x1b8   : > { %s1537_s11 = sshll.u32 %s1643_s14, 7 }
 0x1b9   : > { %s636_s29 = ssub.s32 256, %s1537_s11 }
 0x1ba   : > { %637 = vsyncadd %s601_s17, %s636_s29  ;;  %p835_p7 = scmp.ne.s32.totalorder %s1537_s11, 0  ;;  %s844_s13 = sshll.u32 %s1262_s28, 8 }
 0x1bb   : > { %s1547_s12 = scalar_lea.hbm %s1603_s7, %s844_s13  ;;  %s642_s30 = sshll.u32 %s1485_s18, 4  ;;  %s1550_s30 = int_to_ptr.vmem [resolvable:$true] %s642_s30 }
 0x1bc   : > { %s1099_s20 = scalar_lea.vmem %s1550_s30, %s1537_s11  ;;  %s1198_s9 = smov [#allocation11]  }
 0x1bd   : > { %p1100_p2 = scmp.ne.s32.totalorder %s1550_s30, %s1099_s20  ;;  %s1103_s19 = sshll.u32 %s1198_s9, 4  ;;  %s1104_s19 = int_to_ptr.vmem [resolvable:$false] %s1103_s19 }
 0x1be   : > { %s1105_s28 = scalar_lea.vmem %s1104_s19, 512  ;;  %p1106_p13 = scmp.lt.s32.totalorder %s1550_s30, %s1104_s19 }
 0x1bf   : > { %p1101_p6 = pnand %p1100_p2, %p835_p7  ;;  %p1107_p0 = scmp.lt.s32.totalorder %s1105_s28, %s1099_s20 }
 0x1c1   : > { %p1102_p11 = pneg %p1101_p6  ;;  %p1108_p12 = por %p1107_p0, %p1106_p13 }
 0x1c3   : > { %p1109_p8 = pnand %p1108_p12, %p1102_p11 }
 0x1c5   : > { %1112 = shalt.err (!%p1109_p8)
}
 0x1c6   : > { %s1113_s18 = scalar_lea.hbm %s1547_s12, %s1537_s11  ;;  %s1117_s22 = scalar_lea.hbm %s1603_s7, 384 }
 0x1c7   : > { %p1114_p9 = scmp.ne.s32.totalorder %s1547_s12, %s1113_s18  ;;  %p1118_p10 = scmp.lt.u32.totalorder %s1547_s12, %s1603_s7 }
 0x1c8   : > { %p1119_p5 = scmp.lt.u32.totalorder %s1117_s22, %s1113_s18  ;;  %p1121_p6 = scmp.lt.u32.totalorder %s1113_s18, %s1547_s12 }
 0x1c9   : > { %p1115_p1 = pnand %p1114_p9, %p835_p7 }
 0x1ca   : > { %p1120_p2 = por %p1119_p5, %p1118_p10 }
 0x1cb   : > { %p1116_p3 = pneg %p1115_p1 }
 0x1cc   : > { %p1122_p11 = por %p1121_p6, %p1120_p2 }
 0x1ce   : > { %p1123_p13 = pnand %p1122_p11, %p1116_p3 }
 0x1d0   : > { %1126 = shalt.err (!%p1123_p13)
}
 0x1d1   : > { %s1199_s29 = smov 128   ;;  %s1200_s13 = smov 8  }
 0x1d2   : > { %648 = dma.vmem_to_hbm [thread:$0]  (%p835_p7), %s1550_s30, %s1537_s11, %s1547_s12, %s601_s17, %s1199_s29, %s1199_s29, %s1200_s13  }
 0x1d3 PF: > { %s1629_s21 = sld [smem:[#allocation21_spill]]  ;;  %s657_s8 = sand.u32 1, %s1169_s24  }
 0x1d4   : > { %s658_s20 = scalar_lea.sflag [#allocation4], %s657_s8 }
 0x1d9   : > { %p1630_p0 = scmp.ne.s32.totalorder %s1629_s21, 0 }
 0x1db   : > { %p887_p12 = pnand %p793_p4, %p1630_p0 }
 0x1dd   : > { %1160 = dma.done.wait (!%p887_p12), %s658_s20, 256  }
 0x1de   : > { %1162 = vsyncadd (!%p887_p12), %s658_s20, 4294967040  ;;  %s667_s9 = scalar_lea.sflag [#allocation12], %s657_s8 }
 0x1df   : > { %1164 = dma.done.wait (!%p887_p12), %s667_s9, 256  }
 0x1e0   : > { %1166 = vsyncadd (!%p887_p12), %s667_s9, 4294967040  ;;  %s1631_s27 = sld [smem:[#allocation19_spill]]  ;;  %s1632_s23 = sld [smem:[#allocation20_spill]] }
 0x1e1   : > { %s1633_s24 = smov %s1173_s25  ;;  %s1634_s25 = smov %s1177_s26 }
 0x1e6   : > { %p28_p7 = scmp.ge.s32.totalorder %s1631_s27, 4   ;;  %s1635_s26 = smov %s1632_s23 }
 0x1e8   :  { %30 = sbr.rel (!%p28_p7) target bundleno = 10 (0xa), region = 127 }
 0x1ef   :  { %672 = vsyncpa [#allocation3], 1 }
 0x1f0   :  { %674 = vsyncpa [#allocation3 + $0x1], 1 }
 0x1f1   :  { %675 = vsyncpa [#allocation6], 1 }
 0x1f2   :  { %677 = vsyncpa [#allocation6 + $0x1], 1 }
 0x1f3   :  { %678 = vsyncpa [#allocation9], 1 }
 0x1f4   :  { %679 = vsyncpa [#allocation4], 1 }
 0x1f5   :  { %681 = vsyncpa [#allocation4 + $0x1], 1 }
 0x1f6   :  { %682 = vsyncpa [#allocation12], 1 }
 0x1f7   :  { %684 = vsyncpa [#allocation12 + $0x1], 1 }

</bundles_post_ra>
